<compile_context>
chip_gen: v7x
topology: tpu7x:2x2x1
jax: 0.10.0
libtpu: 0.0.40
codegen_flags: <defaults>
</compile_context>

<pallas_src>
import jax
import jax.numpy as jnp
from jax.experimental import pallas as pl
from jax.experimental.pallas import tpu as pltpu


def _round_up(x, m):
    return ((x + m - 1) // m) * m


def _cdiv(a, b):
    return (a + b - 1) // b


def init_decoder_u_params(key, hidden, dtype=jnp.float32):
    """Params matching Decoder_u(hidden): layers for i = len(hidden)-1 .. 1,
    each Linear(hidden[i], hidden[i-1]).  Stored pre-transposed as
    (in_features, out_features) so the forward computes x @ W + b."""
    params = []
    for i in range(len(hidden) - 1, 0, -1):
        in_f, out_f = hidden[i], hidden[i - 1]
        key, kw, kb = jax.random.split(key, 3)
        bound = 1.0 / (in_f ** 0.5)  # PyTorch nn.Linear default init range
        w = jax.random.uniform(kw, (in_f, out_f), dtype, -bound, bound)
        b = jax.random.uniform(kb, (out_f,), dtype, -bound, bound)
        params.append((w, b))
    return params


def stack_decoder_u_params(params, mxu_dtype=jnp.bfloat16):
    """Zero-pad every layer to one lane-dense (P, P) weight / (1, P) bias shape
    (P = max 128-multiple over all feature dims) and stack along a leading
    layer axis.

    INVARIANT: the pad regions are exactly zero.  Correctness of the fused
    kernel depends on this (padded lanes carry sigmoid(0)=0.5 and are killed by
    the next layer's zero rows).  Always build params through this function.

    Weights are stored in `mxu_dtype` (bf16 halves HBM->VMEM bytes and matches
    the bf16 MXU on v6e/v7x; v5e's MXU also accepts bf16).  Biases stay f32 so
    the elementwise add/sigmoid remain f32 (v5e VPU/EUP have no bf16)."""
    P = 128
    for w, _ in params:
        P = max(P, _round_up(w.shape[0], 128), _round_up(w.shape[1], 128))
    L = len(params)
    w_stack = jnp.zeros((L, P, P), mxu_dtype)
    b_stack = jnp.zeros((L, 1, P), jnp.float32)
    for l, (w, b) in enumerate(params):
        kin, nout = w.shape
        w_stack = w_stack.at[l, :kin, :nout].set(w.astype(mxu_dtype))
        b_stack = b_stack.at[l, 0, :nout].set(b.astype(jnp.float32))
    return w_stack, b_stack


def _make_fused_decoder_kernel(n_layers, k_in, p_dim):
    """Kernel body: x_ref (TM, K), w_ref (L, P, P), b_ref (L, 1, P), out (TM, P)."""

    def kernel(x_ref, w_ref, b_ref, out_ref):
        h = x_ref[...].astype(jnp.float32)                 # (TM, K)
        for l in range(n_layers):                          # unrolled at trace time
            if l == 0 and k_in != p_dim:
                w = w_ref[0, 0:k_in, :]                    # only the real input rows
            else:
                w = w_ref[l]                               # (P, P), mxu dtype
            b = b_ref[l]                                   # (1, P), f32
            # MXU matmul with f32 accumulation; operands in the storage dtype
            # (bf16 on v6e/v7x path), elementwise kept in f32.
            y = jnp.dot(h.astype(w.dtype), w,
                        preferred_element_type=jnp.float32) + b
            h = jax.nn.sigmoid(y)                          # f32 on VPU/EUP
        out_ref[...] = h.astype(out_ref.dtype)

    return kernel


@jax.jit
def decoder_u_forward(x, w_stack, b_stack):
    """Fused Decoder_u forward as a single Pallas kernel.

    Returns the LANE-DENSE padded output of shape (M, P); the real outputs are
    the first hidden[0] columns.  Slice / fuse that column selection in the
    consumer rather than here (an in-wrapper slice would cost an extra HBM
    read+write of the whole output)."""
    M, K = x.shape
    L, P, _ = w_stack.shape

    # Batch (sublane) tiling.
    if M <= 128:
        TM = M                         # single block; full-dim block is always legal
    else:
        # >= 2 grid steps so v7x's two TensorCores both get work; 256-512 row
        # tiles reach ~85% of the HBM roofline vs ~29% at 128.
        TM = min(512, _round_up(_cdiv(M, 2), 128))
    grid = (_cdiv(M, TM),)             # Pallas masks partial last-tile stores

    kernel = _make_fused_decoder_kernel(L, K, P)
    out = pl.pallas_call(
        kernel,
        out_shape=jax.ShapeDtypeStruct((M, P), x.dtype),
        grid=grid,
        in_specs=[
            # x streamed by row tile, unpadded (full-array K as the last dim).
            pl.BlockSpec((TM, K), lambda i: (i, 0)),
            # Stacked weights / biases: constant index_map -> VMEM-resident.
            pl.BlockSpec((L, P, P), lambda i: (0, 0, 0)),
            pl.BlockSpec((L, 1, P), lambda i: (0, 0, 0)),
        ],
        out_specs=pl.BlockSpec((TM, P), lambda i: (i, 0)),
        compiler_params=pltpu.CompilerParams(
            dimension_semantics=("parallel",)),   # shards batch tiles on v7x's 2 TCs
    )(x, w_stack, b_stack)
    return out


def _reference_forward(x, params, mxu_dtype=None):
    """Pure-jnp reference (matches PyTorch Decoder_u forward).  If mxu_dtype is
    given, mimics the kernel's reduced-precision matmul operands."""
    h = x
    for w, b in params:
        if mxu_dtype is not None:
            y = jnp.dot(h.astype(mxu_dtype), w.astype(mxu_dtype),
                        preferred_element_type=jnp.float32) + b
        else:
            y = h @ w + b
        h = jax.nn.sigmoid(y)
    return h


if __name__ == "__main__":
    key = jax.random.PRNGKey(0)

    hidden = [16, 32, 64]   # Decoder_u maps hidden[-1] -> ... -> hidden[0]
    batch = 8

    kx, kp = jax.random.split(key)
    x = jax.random.normal(kx, (batch, hidden[-1]), dtype=jnp.float32)
    params = init_decoder_u_params(kp, hidden)

    # ---- f32 MXU path: exact check against the pure-jnp reference ----------
    w32, b32 = stack_decoder_u_params(params, mxu_dtype=jnp.float32)
    out32_p = jax.block_until_ready(decoder_u_forward(x, w32, b32))
    out32 = out32_p[:, :hidden[0]]            # consumer-side column slice
    assert out32.shape == (batch, hidden[0]), out32.shape
    assert bool(jnp.all(jnp.isfinite(out32)))
    ref32 = _reference_forward(x, params)
    assert bool(jnp.allclose(out32, ref32, atol=1e-5, rtol=1e-5)), (
        float(jnp.max(jnp.abs(out32 - ref32))))

    # ---- bf16 MXU operands (recommended on v6e/v7x; MXU-only bf16 on v5e) ---
    wbf, bbf = stack_decoder_u_params(params, mxu_dtype=jnp.bfloat16)
    outbf_p = jax.block_until_ready(decoder_u_forward(x, wbf, bbf))
    outbf = outbf_p[:, :hidden[0]]
    refbf = _reference_forward(x, params, mxu_dtype=jnp.bfloat16)
    assert bool(jnp.allclose(outbf, refbf, atol=2e-3, rtol=2e-3)), (
        float(jnp.max(jnp.abs(outbf - refbf))))
    assert bool(jnp.allclose(outbf, ref32, atol=3e-2, rtol=3e-2))

    print("KERNEL_OK")
</pallas_src>

<mosaic_0001>
module attributes {stable_mosaic.version = 11 : i64} {
  func.func @kernel(%arg0: i32, %arg1: memref<8x64xf32, #tpu.memory_space<vmem>>, %arg2: memref<2x128x128xf32, #tpu.memory_space<vmem>>, %arg3: memref<2x1x128xf32, #tpu.memory_space<vmem>>, %arg4: memref<8x128xf32, #tpu.memory_space<vmem>>) attributes {dimension_semantics = [#tpu.dimension_semantics<parallel>], iteration_bounds = array<i64: 1>, scalar_prefetch = 0 : i64, scratch_operands = 0 : i64, tpu.core_type = #tpu.core_type<tc>, window_params = [{transform_indices = @transform_0, window_bounds = array<i64: 8, 64>}, {pipeline_mode = #tpu.pipeline_mode<synchronous>, transform_indices = @transform_1, window_bounds = array<i64: 2, 128, 128>}, {pipeline_mode = #tpu.pipeline_mode<synchronous>, transform_indices = @transform_2, window_bounds = array<i64: 2, 1, 128>}, {transform_indices = @transform_3, window_bounds = array<i64: 8, 128>}]} {
    %c0 = arith.constant 0 : index
    %c0_0 = arith.constant 0 : index
    %0 = vector.load %arg1[%c0, %c0_0] : memref<8x64xf32, #tpu.memory_space<vmem>>, vector<8x64xf32>
    %c0_1 = arith.constant 0 : index
    %c0_2 = arith.constant 0 : index
    %c0_3 = arith.constant 0 : index
    %1 = vector.load %arg2[%c0_1, %c0_2, %c0_3] : memref<2x128x128xf32, #tpu.memory_space<vmem>>, vector<1x64x128xf32>
    %2 = vector.shape_cast %1 : vector<1x64x128xf32> to vector<64x128xf32>
    %c0_4 = arith.constant 0 : index
    %c0_5 = arith.constant 0 : index
    %c0_6 = arith.constant 0 : index
    %3 = vector.load %arg3[%c0_4, %c0_5, %c0_6] : memref<2x1x128xf32, #tpu.memory_space<vmem>>, vector<1x1x128xf32>
    %4 = vector.shape_cast %3 : vector<1x1x128xf32> to vector<1x128xf32>
    %cst = arith.constant dense<0.000000e+00> : vector<8x128xf32>
    %5 = tpu.matmul %0, %2, %cst {dimension_numbers = #tpu.dot_dimension_numbers<[1], [0], [0], [1], [0, 0, 1, 1], [], []>} : vector<8x64xf32>, vector<64x128xf32>, vector<8x128xf32> -> vector<8x128xf32>
    %6 = vector.broadcast %4 : vector<1x128xf32> to vector<8x128xf32>
    %7 = arith.addf %5, %6 : vector<8x128xf32>
    %8 = arith.negf %7 : vector<8x128xf32>
    %9 = math.exp %8 : vector<8x128xf32>
    %cst_7 = arith.constant 1.000000e+00 : f32
    %10 = vector.broadcast %cst_7 : f32 to vector<8x128xf32>
    %11 = arith.addf %10, %9 : vector<8x128xf32>
    %12 = arith.divf %10, %11 : vector<8x128xf32>
    %c1 = arith.constant 1 : index
    %c0_8 = arith.constant 0 : index
    %c0_9 = arith.constant 0 : index
    %13 = vector.load %arg2[%c1, %c0_8, %c0_9] : memref<2x128x128xf32, #tpu.memory_space<vmem>>, vector<1x128x128xf32>
    %14 = vector.shape_cast %13 : vector<1x128x128xf32> to vector<128x128xf32>
    %c1_10 = arith.constant 1 : index
    %c0_11 = arith.constant 0 : index
    %c0_12 = arith.constant 0 : index
    %15 = vector.load %arg3[%c1_10, %c0_11, %c0_12] : memref<2x1x128xf32, #tpu.memory_space<vmem>>, vector<1x1x128xf32>
    %16 = vector.shape_cast %15 : vector<1x1x128xf32> to vector<1x128xf32>
    %cst_13 = arith.constant dense<0.000000e+00> : vector<8x128xf32>
    %17 = tpu.matmul %12, %14, %cst_13 {dimension_numbers = #tpu.dot_dimension_numbers<[1], [0], [0], [1], [0, 0, 1, 1], [], []>} : vector<8x128xf32>, vector<128x128xf32>, vector<8x128xf32> -> vector<8x128xf32>
    %18 = vector.broadcast %16 : vector<1x128xf32> to vector<8x128xf32>
    %19 = arith.addf %17, %18 : vector<8x128xf32>
    %20 = arith.negf %19 : vector<8x128xf32>
    %21 = math.exp %20 : vector<8x128xf32>
    %cst_14 = arith.constant 1.000000e+00 : f32
    %22 = vector.broadcast %cst_14 : f32 to vector<8x128xf32>
    %23 = arith.addf %22, %21 : vector<8x128xf32>
    %24 = arith.divf %22, %23 : vector<8x128xf32>
    %c0_15 = arith.constant 0 : index
    %c0_16 = arith.constant 0 : index
    %25 = vector.load %arg4[%c0_15, %c0_16] : memref<8x128xf32, #tpu.memory_space<vmem>>, vector<8x128xf32>
    tpu.vector_store %arg4[%c0_15, %c0_16], %24 {strides = array<i32>} : memref<8x128xf32, #tpu.memory_space<vmem>>, vector<8x128xf32>,
    return
  }
  func.func @transform_0(%arg0: i32) -> (i32, i32) {
    %c0_i32 = arith.constant 0 : i32
    %c0_i32_0 = arith.constant 0 : i32
    return %arg0, %c0_i32 : i32, i32
  }
  func.func @transform_1(%arg0: i32) -> (i32, i32, i32) {
    %c0_i32 = arith.constant 0 : i32
    %c0_i32_0 = arith.constant 0 : i32
    %c0_i32_1 = arith.constant 0 : i32
    %c0_i32_2 = arith.constant 0 : i32
    return %c0_i32, %c0_i32_0, %c0_i32_1 : i32, i32, i32
  }
  func.func @transform_2(%arg0: i32) -> (i32, i32, i32) {
    %c0_i32 = arith.constant 0 : i32
    %c0_i32_0 = arith.constant 0 : i32
    %c0_i32_1 = arith.constant 0 : i32
    %c0_i32_2 = arith.constant 0 : i32
    return %c0_i32, %c0_i32_0, %c0_i32_1 : i32, i32, i32
  }
  func.func @transform_3(%arg0: i32) -> (i32, i32) {
    %c0_i32 = arith.constant 0 : i32
    %c0_i32_0 = arith.constant 0 : i32
    return %arg0, %c0_i32 : i32, i32
  }
}

</mosaic_0001>

<bundles_post_ra>
// kernel: decoder_u_forward.1
= control target key start
LH: loop header
LB: loop body
LE: loop exit
PB: predicated region body
PF: predicated region fallthrough
CT: control target
= control target key end

     0   :  { %8 = vsyncpa [#allocation3], 0  ;;  %s554_s0 = inlined_call_operand.hbm [shape: f32[8,64], index: 0, kind: input, shape index: {}]   ;;  %s555_s1 = inlined_call_operand.hbm [shape: f32[2,128,128], index: 1, kind: input, shape index: {}]   ;;  %s556_s2 = inlined_call_operand.vmem [shape: f32[2,1,128], index: 2, kind: input, shape index: {}]   ;;  %s557_s3 = inlined_call_operand.hbm [shape: f32[8,128], index: 3, kind: output, shape index: {}]  }
   0x1   :  { %9 = vsyncpa [#allocation6], 0 }
   0x2   :  { %10 = vsyncpa [#allocation4], 0  ;;  %s465_s12 = smov [#allocation2]   ;;  %s466_s14 = smov [#allocation5]  }
   0x3   :  { %s17_s13 = sshll.u32 %s465_s12, 4  ;;  %s26_s15 = sshll.u32 %s466_s14, 4  ;;  %s18_s13 = int_to_ptr.vmem [resolvable:$true] %s17_s13  ;;  %s493_s15 = int_to_ptr.vmem [resolvable:$true] %s26_s15 }
   0x4   :  { %s393_s18 = scalar_lea.hbm %s554_s0, 128 }
   0x5   :  { %p394_p0 = scmp.ne.s32.totalorder %s554_s0, %s393_s18  ;;  %p397_p1 = scmp.lt.u32.totalorder %s393_s18, %s554_s0 }
   0x7   :  { %p399_p2 = pnand %p397_p1, %p394_p0 }
   0x9   :  { %402 = shalt.err (!%p399_p2)
}
   0xa   :  { %s403_s23 = scalar_lea.vmem %s18_s13, 128  ;;  %p408_p4 = scmp.lt.s32.totalorder %s18_s13, %s18_s13 }
   0xb   :  { %p404_p3 = scmp.ne.s32.totalorder %s18_s13, %s403_s23  ;;  %p409_p5 = scmp.lt.s32.totalorder %s403_s23, %s403_s23 }
   0xd   :  { %p410_p6 = por %p409_p5, %p408_p4 }
   0xf   :  { %p411_p7 = pnand %p410_p6, %p404_p3 }
  0x11   :  { %414 = shalt.err (!%p411_p7)
}
  0x12   :  { %20 = dma.hbm_to_vmem [thread:$0]  %s554_s0, 128, %s18_s13, [#allocation3]  }
  0x13   :  { %s415_s28 = scalar_lea.hbm %s555_s1, 4096 }
  0x14   :  { %p416_p8 = scmp.ne.s32.totalorder %s555_s1, %s415_s28  ;;  %p419_p9 = scmp.lt.u32.totalorder %s415_s28, %s555_s1 }
  0x16   :  { %p421_p10 = pnand %p419_p9, %p416_p8 }
  0x18   :  { %424 = shalt.err (!%p421_p10)
}
  0x19   :  { %s425_s6 = scalar_lea.vmem %s493_s15, 4096  ;;  %p430_p12 = scmp.lt.s32.totalorder %s493_s15, %s493_s15 }
  0x1a   :  { %p426_p11 = scmp.ne.s32.totalorder %s493_s15, %s425_s6  ;;  %p431_p13 = scmp.lt.s32.totalorder %s425_s6, %s425_s6 }
  0x1c   :  { %p432_p0 = por %p431_p13, %p430_p12 }
  0x1e   :  { %p433_p1 = pnand %p432_p0, %p426_p11 }
  0x20   :  { %436 = shalt.err (!%p433_p1)
}
  0x21   :  { %s467_s0 = smov 128   ;;  %s468_s7 = smov 8  }
  0x22   :  { %32 = dma.hbm_to_vmem [thread:$0]  %s555_s1, 4096, %s493_s15, [#allocation6], %s467_s0, %s467_s0, %s468_s7  }
  0x23   :  { %459 = dma.done.wait [#allocation3], 128  }
  0x24   :  { %460 = vsyncadd [#allocation3], 4294967168 }
  0x25   :  { %461 = dma.done.wait [#allocation6], 4096  }
  0x26   :  { %462 = vsyncadd [#allocation6], 4294963200  ;;  %v469_v0 = vmov 0.0|0.0   ;;  %vm470_vm0 = vmmov 0   ;;  %v471_v1 = vmov 0.0   ;;  %v42_v2 = vld [vmem:[#allocation5] sm:$0xff] }
  0x27   :  { %341 = vmatprep.subr.bf16.mxu0 %v469_v0  ;;  %303 = vmatprep.mubr.msk.f32.mxu0 %vm470_vm0, %v471_v1  ;;  %v43_v3 = vld [vmem:[#allocation5 + $0x8] sm:$0xff]  ;;  %v44_v4 = vld [vmem:[#allocation5 + $0x10] sm:$0xff]  ;;  %v45_v6 = vld [vmem:[#allocation5 + $0x18] sm:$0xff]  ;;  %vm57_vm1 = vcmask 523264   ;;  %s472_s13 = smov [#allocation7]  }
  0x28   :  { %353 = vmatprep.subr.bf16.mxu1 %v469_v0  ;;  %338 = vmatprep.mubr.msk.f32.mxu1 %vm470_vm0, %v471_v1  ;;  %v342_v5 = vpack.c.bf16 %v43_v3, %v42_v2  ;;  %v345_v7 = vpack.c.bf16 %v45_v6, %v44_v4  ;;  %v138_v8 = vld [vmem:[#allocation5 + $0x80] sm:$0xff]  ;;  %v139_v9 = vld [vmem:[#allocation5 + $0x88] sm:$0xff]  ;;  %v48_v14 = vld [vmem:[#allocation5 + $0x30] sm:$0xff]  ;;  %s245_s14 = sshll.u32 %s472_s13, 4  ;;  %s246_s14 = int_to_ptr.vmem [resolvable:$true] %s245_s14 }
  0x29   :  { %v46_v10 = vld [vmem:[#allocation5 + $0x20] sm:$0xff]  ;;  %v47_v11 = vld [vmem:[#allocation5 + $0x28] sm:$0xff]  ;;  %v354_v12 = vpack.c.bf16 %v139_v9, %v138_v8  ;;  %v49_v15 = vld [vmem:[#allocation5 + $0x38] sm:$0xff]  ;;  %s437_s15 = scalar_lea.vmem %s246_s14, 128  ;;  %p442_p3 = scmp.lt.s32.totalorder %s246_s14, %s246_s14 }
  0x2a   :  { %343 = vmatpush3.bf16.msra.mxu0 %v342_v5  ;;  %v348_v13 = vpack.c.bf16 %v47_v11, %v46_v10  ;;  %v351_v16 = vpack.c.bf16 %v49_v15, %v48_v14  ;;  %v41_v17 = vld [vmem:[#allocation2] sm:$0xff]  ;;  %v140_v18 = vld [vmem:[#allocation5 + $0x90] sm:$0xff]  ;;  %v142_v21 = vld [vmem:[#allocation5 + $0xa0] sm:$0xff]  ;;  %p438_p2 = scmp.ne.s32.totalorder %s246_s14, %s437_s15  ;;  %p443_p4 = scmp.lt.s32.totalorder %s437_s15, %s437_s15 }
  0x2b   :  { %344 = vmatprep.subr.bf16.mxu0 %v469_v0  ;;  %355 = vmatpush3.bf16.msra.mxu1 %v354_v12  ;;  %v141_v19 = vld [vmem:[#allocation5 + $0x98] sm:$0xff]  ;;  %v143_v22 = vld [vmem:[#allocation5 + $0xa8] sm:$0xff]  ;;  %v144_v24 = vld [vmem:[#allocation5 + $0xb0] sm:$0xff] }
  0x2c   :  { %356 = vmatprep.subr.bf16.mxu1 %v469_v0  ;;  %v357_v20 = vpack.c.bf16 %v141_v19, %v140_v18  ;;  %v360_v23 = vpack.c.bf16 %v143_v22, %v142_v21  ;;  %v145_v25 = vld [vmem:[#allocation5 + $0xb8] sm:$0xff]  ;;  %v146_v27 = vld [vmem:[#allocation5 + $0xc0] sm:$0xff]  ;;  %v147_v28 = vld [vmem:[#allocation5 + $0xc8] sm:$0xff]  ;;  %p444_p5 = por %p443_p4, %p442_p3 }
  0x2d   :  { %v363_v26 = vpack.c.bf16 %v145_v25, %v144_v24  ;;  %v366_v29 = vpack.c.bf16 %v147_v28, %v146_v27  ;;  %v148_v30 = vld [vmem:[#allocation5 + $0xd0] sm:$0xff]  ;;  %v149_v31 = vld [vmem:[#allocation5 + $0xd8] sm:$0xff]  ;;  %v150_v33 = vld [vmem:[#allocation5 + $0xe0] sm:$0xff] }
  0x2e   :  { %346 = vmatpush3.bf16.msra.mxu0 %v345_v7  ;;  %v369_v32 = vpack.c.bf16 %v149_v31, %v148_v30  ;;  %v151_v34 = vld [vmem:[#allocation5 + $0xe8] sm:$0xff]  ;;  %v152_v36 = vld [vmem:[#allocation5 + $0xf0] sm:$0xff]  ;;  %v153_v37 = vld [vmem:[#allocation5 + $0xf8] sm:$0xff]  ;;  %p445_p6 = pnand %p444_p5, %p438_p2 }
  0x2f   :  { %347 = vmatprep.subr.bf16.mxu0 %v469_v0  ;;  %358 = vmatpush3.bf16.msra.mxu1 %v357_v20  ;;  %v372_v35 = vpack.c.bf16 %v151_v34, %v150_v33  ;;  %v375_v38 = vpack.c.bf16 %v153_v37, %v152_v36  ;;  %v255_v39 = vld [vmem:[%s556_s2] ss:$0 sm:$0xff]  ;;  %v259_v47 = vld [vmem:[%s556_s2 + $0x1] ss:$0 sm:$0xff] }
  0x30   :  { %359 = vmatprep.subr.bf16.mxu1 %v469_v0 }
  0x32   :  { %349 = vmatpush3.bf16.msra.mxu0 %v348_v13 }
  0x33   :  { %350 = vmatprep.subr.bf16.mxu0 %v469_v0  ;;  %361 = vmatpush3.bf16.msra.mxu1 %v360_v23 }
  0x34   :  { %362 = vmatprep.subr.bf16.mxu1 %v469_v0 }
  0x36   :  { %352 = vmatpush3.bf16.msra.mxu0 %v351_v16 }
  0x37   :  { %364 = vmatpush3.bf16.msra.mxu1 %v363_v26 }
  0x38   :  { %365 = vmatprep.subr.bf16.mxu1 %v469_v0 }
  0x39   :  { %304 = vmatmul.mubr.msk.f32.vlgmr.msra.gmra.mrb[0].mxu0 %vm57_vm1, %v41_v17 }
  0x3b   :  { %367 = vmatpush3.bf16.msra.mxu1 %v366_v29 }
  0x3c   :  { %368 = vmatprep.subr.bf16.mxu1 %v469_v0 }
  0x3f   :  { %370 = vmatpush3.bf16.msra.mxu1 %v369_v32 }
  0x40   :  { %371 = vmatprep.subr.bf16.mxu1 %v469_v0 }
  0x43   :  { %373 = vmatpush3.bf16.msra.mxu1 %v372_v35 }
  0x44   :  { %374 = vmatprep.subr.bf16.mxu1 %v469_v0 }
  0x47   :  { %376 = vmatpush3.bf16.msra.mxu1 %v375_v38 }
 0x10c   :  { %v127_v40 = vpop.f32.mrb[0].mxu0 }
 0x10d   :  { %v128_v41 = vadd.f32 %v255_v39, %v127_v40  ;;  %v305_v42 = vpop.f32.mrb[1].mxu0 }
 0x10f   :  { %v257_v43 = vmul.f32 -1.442695, %v128_v41 }
 0x111   :  { %385 = vpow2.f32 %v257_v43 }
 0x11b   :  { %v386_v44 = vpop.eup %385 }
 0x11c   :  { %v134_v45 = vadd.f32 1.0, %v386_v44 }
 0x11e   :  { %387 = vrcp.f32 %v134_v45 }
 0x128   :  { %v388_v46 = vpop.eup %387 }
 0x129   :  { %339 = vmatmul.mubr.f32.vlgmr.msra.gmra.mrb[0].mxu1 %v388_v46 }
 0x1fc   :  { %v228_v48 = vpop.f32.mrb[0].mxu1 }
 0x1fd   :  { %v229_v49 = vadd.f32 %v259_v47, %v228_v48  ;;  %v340_v50 = vpop.f32.mrb[1].mxu1 }
 0x1ff   :  { %v260_v51 = vmul.f32 -1.442695, %v229_v49 }
 0x201   :  { %389 = vpow2.f32 %v260_v51 }
 0x20b   :  { %v390_v52 = vpop.eup %389 }
 0x20c   :  { %v235_v53 = vadd.f32 1.0, %v390_v52 }
 0x20e   :  { %391 = vrcp.f32 %v235_v53 }
 0x218   :  { %v392_v54 = vpop.eup %391 }
 0x219   :  { %238 = vst [vmem:[#allocation7] sm:$0xff] %v392_v54 }
 0x21a   :  { %448 = shalt.err (!%p445_p6)
}
 0x21b   :  { %s449_s17 = scalar_lea.hbm %s557_s3, 128 }
 0x21c   :  { %p450_p7 = scmp.ne.s32.totalorder %s557_s3, %s449_s17  ;;  %p453_p8 = scmp.lt.u32.totalorder %s449_s17, %s557_s3 }
 0x21e   :  { %p455_p9 = pnand %p453_p8, %p450_p7 }
 0x220   :  { %458 = shalt.err (!%p455_p9)
}
 0x221   :  { %248 = dma.vmem_to_hbm [thread:$0]  %s246_s14, 128, %s557_s3, [#allocation4]  }
 0x222   :  { %463 = dma.done.wait [#allocation4], 128  }
 0x223   :  { %464 = vsyncadd [#allocation4], 4294967168 }
 0x224   :  { %252 = vsyncpa [#allocation3], 1 }
 0x225   :  { %253 = vsyncpa [#allocation6], 1 }
 0x226   :  { %254 = vsyncpa [#allocation4], 1 }

</bundles_post_ra>
